<compile_context>
chip_gen: v7x
topology: tpu7x:2x2x1
jax: 0.10.0
libtpu: 0.0.40
codegen_flags: <defaults>
</compile_context>

<pallas_src>
import jax
import jax.numpy as jnp
from jax.experimental import pallas as pl
from jax.experimental.pallas import tpu as pltpu

IN_FEATURES = 28 * 28      # 784
K_PAD = 896                # 7 * 128 : lane-aligned contraction dim
HIDDEN = 128
OUT_FEATURES = 10
OUT_PAD = 128              # lane-dense output width (slice back to 10 outside)
TB_MAX = 512               # batch tile (multiple of 8; fits v5e/v6e/v7x VMEM budgets)


def _round_up(x, m):
    return (x + m - 1) // m * m


def mlp_kernel(x_ref, w1_ref, b1_ref, w2_ref, b2_ref, o_ref):
    # x_ref : (TB, 896)  bf16     w1_ref: (896, 128) bf16    b1_ref: (1, 128) f32
    # w2_ref: (128, 128) f32      b2_ref: (1, 128)   f32     o_ref : (TB, 128) f32
    # First linear: bf16 operands on the MXU, f32 accumulation.
    h = jnp.dot(x_ref[...], w1_ref[...], preferred_element_type=jnp.float32)
    # Bias + ReLU in f32 on the VPU (v5e has no bf16 VPU path).
    h = jnp.maximum(h + b1_ref[...], 0.0)
    # Second linear: tiny (128x128) f32 matmul, lane-dense 128-wide output.
    y = jnp.dot(h, w2_ref[...], preferred_element_type=jnp.float32)
    o_ref[...] = (y + b2_ref[...]).astype(o_ref.dtype)


def net_forward(x, w1, b1, w2, b2, *, tb=None):
    """x: (B, ...) with prod(...) == 784. Returns (B, 10) float32.

    w1: (784, 128), b1: (128,), w2: (128, 10), b2: (10,)  -- (in, out) layout,
    so y = x @ W + b (matches torch's x @ W.T + b for W_torch=(out, in)).
    """
    B = x.shape[0]
    x_flat = x.reshape(B, -1).astype(jnp.float32)
    assert x_flat.shape[1] == IN_FEATURES

    # --- batch tile selection & padding -------------------------------------
    if tb is None:
        tb = min(TB_MAX, _round_up(B, 8))       # >=8 sublanes even for tiny B
    b_pad = _round_up(B, tb)

    # --- pad K (784 -> 896) and N (10 -> 128) once in the wrapper -----------
    x_p = jnp.pad(x_flat, ((0, b_pad - B), (0, K_PAD - IN_FEATURES)))
    w1_p = jnp.pad(w1, ((0, K_PAD - IN_FEATURES), (0, 0)))          # (896, 128)
    w2_p = jnp.pad(w2, ((0, 0), (0, OUT_PAD - OUT_FEATURES)))       # (128, 128)
    b1_2d = b1.reshape(1, HIDDEN).astype(jnp.float32)
    b2_2d = jnp.pad(b2.reshape(1, OUT_FEATURES),
                    ((0, 0), (0, OUT_PAD - OUT_FEATURES))).astype(jnp.float32)

    # bf16 matmul operands for the dominant (big-K) matmul; halves input DMA.
    x_bf16 = x_p.astype(jnp.bfloat16)
    w1_bf16 = w1_p.astype(jnp.bfloat16)
    w2_f32 = w2_p.astype(jnp.float32)

    grid = (b_pad // tb,)

    flops = 2 * b_pad * (K_PAD * HIDDEN + HIDDEN * OUT_PAD)
    bytes_accessed = (x_bf16.size * 2 + w1_bf16.size * 2 + b1_2d.size * 4
                      + w2_f32.size * 4 + b2_2d.size * 4 + b_pad * OUT_PAD * 4)

    out = pl.pallas_call(
        mlp_kernel,
        out_shape=jax.ShapeDtypeStruct((b_pad, OUT_PAD), jnp.float32),
        grid=grid,
        in_specs=[
            pl.BlockSpec((tb, K_PAD), lambda i: (i, 0)),        # batch-tiled input
            pl.BlockSpec((K_PAD, HIDDEN), lambda i: (0, 0)),    # resident weights
            pl.BlockSpec((1, HIDDEN), lambda i: (0, 0)),
            pl.BlockSpec((HIDDEN, OUT_PAD), lambda i: (0, 0)),
            pl.BlockSpec((1, OUT_PAD), lambda i: (0, 0)),
        ],
        out_specs=pl.BlockSpec((tb, OUT_PAD), lambda i: (i, 0)),
        compiler_params=pltpu.CompilerParams(
            dimension_semantics=("parallel",),          # megacore-shard batch axis
            vmem_limit_bytes=32 * 1024 * 1024,          # safe on v5e/v6e/v7x
        ),
        cost_estimate=pl.CostEstimate(
            flops=flops, transcendentals=0, bytes_accessed=bytes_accessed),
    )(x_bf16, w1_bf16, b1_2d, w2_f32, b2_2d)

    return out[:B, :OUT_FEATURES]


def init_params(key):
    """Deterministic init mirroring nn.Linear default (uniform +/- 1/sqrt(fan_in))."""
    k1, k2, k3, k4 = jax.random.split(key, 4)
    bound1 = 1.0 / jnp.sqrt(IN_FEATURES)
    bound2 = 1.0 / jnp.sqrt(HIDDEN)
    # Stored as (in, out) so kernel does x @ W (equivalent to torch x @ W.T).
    w1 = jax.random.uniform(k1, (IN_FEATURES, HIDDEN), jnp.float32, -bound1, bound1)
    b1 = jax.random.uniform(k2, (HIDDEN,), jnp.float32, -bound1, bound1)
    w2 = jax.random.uniform(k3, (HIDDEN, OUT_FEATURES), jnp.float32, -bound2, bound2)
    b2 = jax.random.uniform(k4, (OUT_FEATURES,), jnp.float32, -bound2, bound2)
    return w1, b1, w2, b2


if __name__ == "__main__":
    key = jax.random.PRNGKey(0)
    k_x, k_p = jax.random.split(key)

    # Small batch of MNIST-shaped inputs: (B, 1, 28, 28) NCHW, as in torch.
    B = 2
    x = jax.random.normal(k_x, (B, 1, 28, 28), dtype=jnp.float32)

    w1, b1, w2, b2 = init_params(k_p)

    out = net_forward(x, w1, b1, w2, b2)
    out = jax.block_until_ready(out)
    assert out.shape == (B, OUT_FEATURES)

    # Reference 1: same math as the kernel (bf16 first-matmul operands, f32 acc).
    x_flat = x.reshape(B, -1)
    xb = x_flat.astype(jnp.bfloat16).astype(jnp.float32)
    w1b = w1.astype(jnp.bfloat16).astype(jnp.float32)
    h_ref = jnp.maximum(xb @ w1b + b1, 0.0)
    ref_matched = h_ref @ w2 + b2
    assert jnp.allclose(out, ref_matched, atol=1e-3, rtol=1e-3)

    # Reference 2: full-f32 reference -- loose tolerance covers the bf16 cast.
    ref_f32 = jnp.maximum(x_flat @ w1 + b1, 0.0) @ w2 + b2
    assert jnp.allclose(out, ref_f32, atol=1e-1, rtol=1e-1)

    print("KERNEL_OK")
</pallas_src>

<mosaic_0001>
module attributes {stable_mosaic.version = 11 : i64} {
  func.func @mlp_kernel(%arg0: i32, %arg1: memref<8x896xbf16, #tpu.memory_space<vmem>>, %arg2: memref<896x128xbf16, #tpu.memory_space<vmem>>, %arg3: memref<1x128xf32, #tpu.memory_space<vmem>>, %arg4: memref<128x128xf32, #tpu.memory_space<vmem>>, %arg5: memref<1x128xf32, #tpu.memory_space<vmem>>, %arg6: memref<8x128xf32, #tpu.memory_space<vmem>>) attributes {dimension_semantics = [#tpu.dimension_semantics<parallel>], iteration_bounds = array<i64: 1>, scalar_prefetch = 0 : i64, scratch_operands = 0 : i64, tpu.core_type = #tpu.core_type<tc>, window_params = [{transform_indices = @transform_0, window_bounds = array<i64: 8, 896>}, {pipeline_mode = #tpu.pipeline_mode<synchronous>, transform_indices = @transform_1, window_bounds = array<i64: 896, 128>}, {pipeline_mode = #tpu.pipeline_mode<synchronous>, transform_indices = @transform_2, window_bounds = array<i64: 1, 128>}, {pipeline_mode = #tpu.pipeline_mode<synchronous>, transform_indices = @transform_3, window_bounds = array<i64: 128, 128>}, {pipeline_mode = #tpu.pipeline_mode<synchronous>, transform_indices = @transform_4, window_bounds = array<i64: 1, 128>}, {transform_indices = @transform_5, window_bounds = array<i64: 8, 128>}]} {
    %c0 = arith.constant 0 : index
    %c0_0 = arith.constant 0 : index
    %0 = vector.load %arg1[%c0, %c0_0] : memref<8x896xbf16, #tpu.memory_space<vmem>>, vector<8x896xbf16>
    %c0_1 = arith.constant 0 : index
    %c0_2 = arith.constant 0 : index
    %1 = vector.load %arg2[%c0_1, %c0_2] : memref<896x128xbf16, #tpu.memory_space<vmem>>, vector<896x128xbf16>
    %cst = arith.constant dense<0.000000e+00> : vector<8x128xf32>
    %2 = tpu.matmul %0, %1, %cst {dimension_numbers = #tpu.dot_dimension_numbers<[1], [0], [0], [1], [0, 0, 1, 1], [], []>} : vector<8x896xbf16>, vector<896x128xbf16>, vector<8x128xf32> -> vector<8x128xf32>
    %c0_3 = arith.constant 0 : index
    %c0_4 = arith.constant 0 : index
    %3 = vector.load %arg3[%c0_3, %c0_4] : memref<1x128xf32, #tpu.memory_space<vmem>>, vector<1x128xf32>
    %4 = vector.broadcast %3 : vector<1x128xf32> to vector<8x128xf32>
    %5 = arith.addf %2, %4 : vector<8x128xf32>
    %cst_5 = arith.constant 0.000000e+00 : f32
    %6 = vector.broadcast %cst_5 : f32 to vector<8x128xf32>
    %7 = arith.maximumf %5, %6 : vector<8x128xf32>
    %c0_6 = arith.constant 0 : index
    %c0_7 = arith.constant 0 : index
    %8 = vector.load %arg4[%c0_6, %c0_7] : memref<128x128xf32, #tpu.memory_space<vmem>>, vector<128x128xf32>
    %cst_8 = arith.constant dense<0.000000e+00> : vector<8x128xf32>
    %9 = tpu.matmul %7, %8, %cst_8 {dimension_numbers = #tpu.dot_dimension_numbers<[1], [0], [0], [1], [0, 0, 1, 1], [], []>} : vector<8x128xf32>, vector<128x128xf32>, vector<8x128xf32> -> vector<8x128xf32>
    %c0_9 = arith.constant 0 : index
    %c0_10 = arith.constant 0 : index
    %10 = vector.load %arg5[%c0_9, %c0_10] : memref<1x128xf32, #tpu.memory_space<vmem>>, vector<1x128xf32>
    %11 = vector.broadcast %10 : vector<1x128xf32> to vector<8x128xf32>
    %12 = arith.addf %9, %11 : vector<8x128xf32>
    %c0_11 = arith.constant 0 : index
    %c0_12 = arith.constant 0 : index
    %13 = vector.load %arg6[%c0_11, %c0_12] : memref<8x128xf32, #tpu.memory_space<vmem>>, vector<8x128xf32>
    tpu.vector_store %arg6[%c0_11, %c0_12], %12 {strides = array<i32>} : memref<8x128xf32, #tpu.memory_space<vmem>>, vector<8x128xf32>,
    return
  }
  func.func @transform_0(%arg0: i32) -> (i32, i32) {
    %c0_i32 = arith.constant 0 : i32
    %c0_i32_0 = arith.constant 0 : i32
    return %arg0, %c0_i32 : i32, i32
  }
  func.func @transform_1(%arg0: i32) -> (i32, i32) {
    %c0_i32 = arith.constant 0 : i32
    %c0_i32_0 = arith.constant 0 : i32
    %c0_i32_1 = arith.constant 0 : i32
    return %c0_i32, %c0_i32_0 : i32, i32
  }
  func.func @transform_2(%arg0: i32) -> (i32, i32) {
    %c0_i32 = arith.constant 0 : i32
    %c0_i32_0 = arith.constant 0 : i32
    %c0_i32_1 = arith.constant 0 : i32
    return %c0_i32, %c0_i32_0 : i32, i32
  }
  func.func @transform_3(%arg0: i32) -> (i32, i32) {
    %c0_i32 = arith.constant 0 : i32
    %c0_i32_0 = arith.constant 0 : i32
    %c0_i32_1 = arith.constant 0 : i32
    return %c0_i32, %c0_i32_0 : i32, i32
  }
  func.func @transform_4(%arg0: i32) -> (i32, i32) {
    %c0_i32 = arith.constant 0 : i32
    %c0_i32_0 = arith.constant 0 : i32
    %c0_i32_1 = arith.constant 0 : i32
    return %c0_i32, %c0_i32_0 : i32, i32
  }
  func.func @transform_5(%arg0: i32) -> (i32, i32) {
    %c0_i32 = arith.constant 0 : i32
    %c0_i32_0 = arith.constant 0 : i32
    return %arg0, %c0_i32 : i32, i32
  }
}

</mosaic_0001>

<bundles_post_ra>
// kernel: tpu_custom_call.1
= control target key start
LH: loop header
LB: loop body
LE: loop exit
PB: predicated region body
PF: predicated region fallthrough
CT: control target
= control target key end

     0   :  { %10 = vsyncpa [#allocation3], 0  ;;  %s1317_s0 = inlined_call_operand.hbm [shape: bf16[8,896], index: 0, kind: input, shape index: {}]   ;;  %s1318_s1 = inlined_call_operand.hbm [shape: bf16[896,128], index: 1, kind: input, shape index: {}]   ;;  %s1319_s2 = inlined_call_operand.vmem [shape: f32[1,128], index: 2, kind: input, shape index: {}]   ;;  %s1320_s3 = inlined_call_operand.hbm [shape: f32[128,128], index: 3, kind: input, shape index: {}]   ;;  %s1321_s4 = inlined_call_operand.vmem [shape: f32[1,128], index: 4, kind: input, shape index: {}]   ;;  %s1322_s5 = inlined_call_operand.hbm [shape: f32[8,128], index: 5, kind: output, shape index: {}]  }
   0x1   :  { %11 = vsyncpa [#allocation6], 0 }
   0x2   :  { %12 = vsyncpa [#allocation4], 0  ;;  %s1220_s18 = smov [#allocation5]   ;;  %s1126_s22 = scalar_lea.hbm %s1318_s1, 7168 }
   0x3   :  { %s28_s19 = sshll.u32 %s1220_s18, 4  ;;  %p1127_p0 = scmp.ne.s32.totalorder %s1318_s1, %s1126_s22  ;;  %s29_s19 = int_to_ptr.vmem [resolvable:$true] %s28_s19 }
   0x4   :  { %p1130_p1 = scmp.lt.u32.totalorder %s1126_s22, %s1318_s1 }
   0x6   :  { %p1132_p2 = pnand %p1130_p1, %p1127_p0 }
   0x8   :  { %1135 = shalt.err (!%p1132_p2)
}
   0x9   :  { %s1136_s27 = scalar_lea.vmem %s29_s19, 7168  ;;  %p1141_p4 = scmp.lt.s32.totalorder %s29_s19, %s29_s19 }
   0xa   :  { %p1137_p3 = scmp.ne.s32.totalorder %s29_s19, %s1136_s27  ;;  %p1142_p5 = scmp.lt.s32.totalorder %s1136_s27, %s1136_s27 }
   0xc   :  { %p1143_p6 = por %p1142_p5, %p1141_p4 }
   0xe   :  { %p1144_p7 = pnand %p1143_p6, %p1137_p3 }
  0x10   :  { %1147 = shalt.err (!%p1144_p7)
}
  0x11   :  { %s1221_s28 = smov 64   ;;  %s1222_s29 = smov 4  }
  0x12   :  { %34 = dma.hbm_to_vmem [thread:$0]  %s1318_s1, 7168, %s29_s19, [#allocation6], %s1221_s28, %s1221_s28, %s1222_s29  }
  0x13   :  { %s1223_s7 = smov [#allocation2]   ;;  %s1224_s9 = smov [#allocation7]  }
  0x14   :  { %s19_s8 = sshll.u32 %s1223_s7, 4  ;;  %s42_s10 = sshll.u32 %s1224_s9, 4  ;;  %s20_s8 = int_to_ptr.vmem [resolvable:$true] %s19_s8  ;;  %s43_s10 = int_to_ptr.vmem [resolvable:$true] %s42_s10 }
  0x15   :  { %s1148_s13 = scalar_lea.hbm %s1317_s0, 448 }
  0x16   :  { %p1149_p8 = scmp.ne.s32.totalorder %s1317_s0, %s1148_s13  ;;  %p1152_p9 = scmp.lt.u32.totalorder %s1148_s13, %s1317_s0 }
  0x18   :  { %p1154_p10 = pnand %p1152_p9, %p1149_p8 }
  0x1a   :  { %1157 = shalt.err (!%p1154_p10)
}
  0x1b   :  { %s1158_s1 = scalar_lea.vmem %s20_s8, 448  ;;  %p1163_p12 = scmp.lt.s32.totalorder %s20_s8, %s20_s8 }
  0x1c   :  { %p1159_p11 = scmp.ne.s32.totalorder %s20_s8, %s1158_s1  ;;  %p1164_p13 = scmp.lt.s32.totalorder %s1158_s1, %s1158_s1 }
  0x1e   :  { %p1165_p0 = por %p1164_p13, %p1163_p12 }
  0x20   :  { %p1166_p1 = pnand %p1165_p0, %p1159_p11 }
  0x22   :  { %1169 = shalt.err (!%p1166_p1)
}
  0x23   :  { %22 = dma.hbm_to_vmem [thread:$0]  %s1317_s0, 448, %s20_s8, [#allocation3]  }
  0x24   :  { %s1170_s22 = scalar_lea.hbm %s1320_s3, 2048 }
  0x25   :  { %p1171_p2 = scmp.ne.s32.totalorder %s1320_s3, %s1170_s22  ;;  %p1174_p3 = scmp.lt.u32.totalorder %s1170_s22, %s1320_s3 }
  0x27   :  { %p1176_p4 = pnand %p1174_p3, %p1171_p2 }
  0x29   :  { %1179 = shalt.err (!%p1176_p4)
}
  0x2a   :  { %s1180_s27 = scalar_lea.vmem %s43_s10, 2048  ;;  %p1185_p6 = scmp.lt.s32.totalorder %s43_s10, %s43_s10 }
  0x2b   :  { %p1181_p5 = scmp.ne.s32.totalorder %s43_s10, %s1180_s27  ;;  %p1186_p7 = scmp.lt.s32.totalorder %s1180_s27, %s1180_s27 }
  0x2d   :  { %p1187_p8 = por %p1186_p7, %p1185_p6 }
  0x2f   :  { %p1188_p9 = pnand %p1187_p8, %p1181_p5 }
  0x31   :  { %1191 = shalt.err (!%p1188_p9)
}
  0x32   :  { %s1225_s0 = smov 128   ;;  %s1226_s28 = smov 8  }
  0x33   :  { %48 = dma.hbm_to_vmem [thread:$0]  %s1320_s3, 2048, %s43_s10, [#allocation6], %s1225_s0, %s1225_s0, %s1226_s28  }
  0x34   :  { %1214 = dma.done.wait [#allocation3], 448  }
  0x35   :  { %1215 = vsyncadd [#allocation3], 4294966848 }
  0x36   :  { %1216 = dma.done.wait [#allocation6], 9216  }
  0x37   :  { %1217 = vsyncadd [#allocation6], 4294958080  ;;  %v1063_v0 = vld [vmem:[#allocation5 + $0x40] sm:$0xff]   ;;  %v1067_v4 = vld [vmem:[#allocation5 + $0x48] sm:$0xff]   ;;  %v1227_v42 = vmov 0.0   ;;  %vm1228_vm0 = vmmov 0  }
  0x38   :  { %v1064_v1 = vld [vmem:[#allocation5] sm:$0xff]   ;;  %881 = vmatprep.subr.bf16.mxu0 %v1063_v0  ;;  %v1068_v5 = vld [vmem:[#allocation5 + $0x8] sm:$0xff]   ;;  %v1071_v8 = vld [vmem:[#allocation5 + $0x50] sm:$0xff]   ;;  %s1230_s8 = smov [#allocation8]  }
  0x39   :  { %v1065_v2 = vld [vmem:[#allocation5 + $0xc0] sm:$0xff]   ;;  %882 = vmatpush3.bf16.msra.mxu0 %v1064_v1  ;;  %v1069_v6 = vld [vmem:[#allocation5 + $0xc8] sm:$0xff]   ;;  %v1072_v9 = vld [vmem:[#allocation5 + $0x10] sm:$0xff]   ;;  %s806_s9 = sshll.u32 %s1230_s8, 4  ;;  %s807_s9 = int_to_ptr.vmem [resolvable:$true] %s806_s9 }
  0x3a   :  { %v1066_v3 = vld [vmem:[#allocation5 + $0x80] sm:$0xff]   ;;  %903 = vmatprep.subr.bf16.mxu1 %v1065_v2  ;;  %883 = vmatprep.subr.bf16.mxu0 %v1067_v4  ;;  %v1070_v7 = vld [vmem:[#allocation5 + $0x88] sm:$0xff]   ;;  %v1073_v10 = vld [vmem:[#allocation5 + $0xd0] sm:$0xff]   ;;  %s1192_s10 = scalar_lea.vmem %s807_s9, 128  ;;  %p1197_p11 = scmp.lt.s32.totalorder %s807_s9, %s807_s9 }
  0x3b   :  { %904 = vmatpush3.bf16.msra.mxu1 %v1066_v3  ;;  %v1074_v11 = vld [vmem:[#allocation5 + $0x90] sm:$0xff]   ;;  %v1075_v12 = vld [vmem:[#allocation5 + $0x58] sm:$0xff]   ;;  %v1079_v16 = vld [vmem:[#allocation5 + $0x60] sm:$0xff]   ;;  %p1193_p10 = scmp.ne.s32.totalorder %s807_s9, %s1192_s10  ;;  %p1198_p12 = scmp.lt.s32.totalorder %s1192_s10, %s1192_s10 }
  0x3c   :  { %905 = vmatprep.subr.bf16.mxu1 %v1069_v6  ;;  %v1076_v13 = vld [vmem:[#allocation5 + $0x18] sm:$0xff]   ;;  %v1080_v17 = vld [vmem:[#allocation5 + $0x20] sm:$0xff]   ;;  %v1083_v20 = vld [vmem:[#allocation5 + $0x68] sm:$0xff]   ;;  %v1229_v6 = vmov 0.0|0.0  }
  0x3d   :  { %884 = vmatpush3.bf16.msra.mxu0 %v1068_v5  ;;  %v1077_v14 = vld [vmem:[#allocation5 + $0xd8] sm:$0xff]   ;;  %v1081_v18 = vld [vmem:[#allocation5 + $0xe0] sm:$0xff]   ;;  %v1084_v21 = vld [vmem:[#allocation5 + $0x28] sm:$0xff]   ;;  %p1199_p13 = por %p1198_p12, %p1197_p11 }
  0x3e   :  { %885 = vmatprep.subr.bf16.mxu0 %v1071_v8  ;;  %v1078_v15 = vld [vmem:[#allocation5 + $0x98] sm:$0xff]   ;;  %v1082_v19 = vld [vmem:[#allocation5 + $0xa0] sm:$0xff]   ;;  %v1085_v22 = vld [vmem:[#allocation5 + $0xe8] sm:$0xff]  }
  0x3f   :  { %906 = vmatpush3.bf16.msra.mxu1 %v1070_v7  ;;  %v1086_v23 = vld [vmem:[#allocation5 + $0xa8] sm:$0xff]   ;;  %v1087_v24 = vld [vmem:[#allocation5 + $0x70] sm:$0xff]   ;;  %v1091_v28 = vld [vmem:[#allocation5 + $0x78] sm:$0xff]   ;;  %p1200_p0 = pnand %p1199_p13, %p1193_p10 }
  0x40   :  { %907 = vmatprep.subr.bf16.mxu1 %v1073_v10  ;;  %v1088_v25 = vld [vmem:[#allocation5 + $0x30] sm:$0xff]   ;;  %v1092_v29 = vld [vmem:[#allocation5 + $0x38] sm:$0xff]   ;;  %v61_v31 = vld [vmem:[#allocation2] sm:$0xff] }
  0x41   :  { %886 = vmatpush3.bf16.msra.mxu0 %v1072_v9  ;;  %v1089_v26 = vld [vmem:[#allocation5 + $0xf0] sm:$0xff]   ;;  %v1093_v30 = vld [vmem:[#allocation5 + $0xf8] sm:$0xff]   ;;  %v817_v32 = vcombine.low %v61_v31, %v61_v31  ;;  %v818_v33 = vcombine.high %v61_v31, %v61_v31  ;;  %v1097_v35 = vld [vmem:[#allocation5 + $0x140] sm:$0xff]  }
  0x42   :  { %887 = vmatprep.subr.bf16.mxu0 %v1075_v12  ;;  %v1090_v27 = vld [vmem:[#allocation5 + $0xb0] sm:$0xff]   ;;  %v1096_v34 = vld [vmem:[#allocation5 + $0xb8] sm:$0xff]   ;;  %v1100_v39 = vld [vmem:[#allocation5 + $0x100] sm:$0xff]  }
  0x43   :  { %908 = vmatpush3.bf16.msra.mxu1 %v1074_v11  ;;  %v62_v36 = vld [vmem:[#allocation2 + $0x8] sm:$0xff]  ;;  %577 = vmatprep.mubr.bf16.mxu0 %v818_v33  ;;  %v1101_v40 = vld [vmem:[#allocation5 + $0x180] sm:$0xff]   ;;  %v1108_v48 = vld [vmem:[#allocation5 + $0x158] sm:$0xff]  }
  0x44   :  { %909 = vmatprep.subr.bf16.mxu1 %v1077_v14  ;;  %v819_v37 = vcombine.low %v62_v36, %v62_v36  ;;  %v820_v38 = vcombine.high %v62_v36, %v62_v36  ;;  %v1102_v41 = vld [vmem:[#allocation5 + $0x148] sm:$0xff]   ;;  %v1105_v45 = vld [vmem:[#allocation5 + $0x150] sm:$0xff]   ;;  %v1109_v49 = vld [vmem:[#allocation5 + $0x118] sm:$0xff]  }
  0x45   :  { %888 = vmatpush3.bf16.msra.mxu0 %v1076_v13  ;;  %v1103_v43 = vld [vmem:[#allocation5 + $0x108] sm:$0xff]   ;;  %v1106_v46 = vld [vmem:[#allocation5 + $0x110] sm:$0xff]   ;;  %v1111_v50 = vld [vmem:[#allocation5 + $0x160] sm:$0xff]  }
  0x46   :  { %889 = vmatprep.subr.bf16.mxu0 %v1079_v16  ;;  %617 = vmatprep.mubr.bf16.mxu1 %v820_v38  ;;  %v1104_v44 = vld [vmem:[#allocation5 + $0x188] sm:$0xff]   ;;  %v1107_v47 = vld [vmem:[#allocation5 + $0x190] sm:$0xff]   ;;  %v1110_v51 = vld [vmem:[#allocation5 + $0x198] sm:$0xff]  }
  0x47   :  { %910 = vmatpush3.bf16.msra.mxu1 %v1078_v15  ;;  %v1112_v52 = vld [vmem:[#allocation5 + $0x120] sm:$0xff]   ;;  %v1114_v53 = vld [vmem:[#allocation5 + $0x168] sm:$0xff]   ;;  %v1117_v56 = vld [vmem:[#allocation5 + $0x170] sm:$0xff]  }
  0x48   :  { %911 = vmatprep.subr.bf16.mxu1 %v1081_v18  ;;  %v1113_v54 = vld [vmem:[#allocation5 + $0x1a0] sm:$0xff]   ;;  %v1115_v55 = vld [vmem:[#allocation5 + $0x128] sm:$0xff]   ;;  %v63_v58 = vld [vmem:[#allocation2 + $0x10] sm:$0xff] }
  0x49   :  { %890 = vmatpush3.bf16.msra.mxu0 %v1080_v17  ;;  %v1116_v57 = vld [vmem:[#allocation5 + $0x1a8] sm:$0xff]   ;;  %v1118_v59 = vld [vmem:[#allocation5 + $0x130] sm:$0xff]   ;;  %v822_v60 = vcombine.high %v63_v58, %v63_v58  ;;  %v1120_v61 = vld [vmem:[#allocation5 + $0x178] sm:$0xff]   ;;  %v821_v1 = vcombine.low %v63_v58, %v63_v58 }
  0x4a   :  { %891 = vmatprep.subr.bf16.mxu0 %v1083_v20  ;;  %v1119_v62 = vld [vmem:[#allocation5 + $0x1b0] sm:$0xff]   ;;  %v1121_v63 = vld [vmem:[#allocation5 + $0x138] sm:$0xff]   ;;  %v706_v3 = vld [vmem:[#allocation7] sm:$0xff] }
  0x4b   :  { %912 = vmatpush3.bf16.msra.mxu1 %v1082_v19  ;;  %v1124_v0 = vld [vmem:[#allocation5 + $0x1b8] sm:$0xff]   ;;  %v707_v4 = vld [vmem:[#allocation7 + $0x8] sm:$0xff]  ;;  %v708_v5 = vld [vmem:[#allocation7 + $0x10] sm:$0xff] }
  0x4c   :  { %913 = vmatprep.subr.bf16.mxu1 %v1085_v22  ;;  %v1125_v2 = vld [vmem:[#allocation2 + $0x18] ss:$0 sps:$4 sm:$0xff]   ;;  %v1029_v7 = vpack.c.bf16 %v707_v4, %v706_v3  ;;  %v710_v10 = vld [vmem:[#allocation7 + $0x20] sm:$0xff]  ;;  %v711_v11 = vld [vmem:[#allocation7 + $0x28] sm:$0xff] }
  0x4d   :  { %892 = vmatpush3.bf16.msra.mxu0 %v1084_v21  ;;  %v709_v8 = vld [vmem:[#allocation7 + $0x18] sm:$0xff]  ;;  %v1035_v12 = vpack.c.bf16 %v711_v11, %v710_v10  ;;  %v712_v13 = vld [vmem:[#allocation7 + $0x30] sm:$0xff]  ;;  %v714_v16 = vld [vmem:[#allocation7 + $0x40] sm:$0xff] }
  0x4e   :  { %893 = vmatprep.subr.bf16.mxu0 %v1087_v24  ;;  %v1032_v9 = vpack.c.bf16 %v709_v8, %v708_v5  ;;  %v713_v14 = vld [vmem:[#allocation7 + $0x38] sm:$0xff]  ;;  %v715_v17 = vld [vmem:[#allocation7 + $0x48] sm:$0xff]  ;;  %v716_v19 = vld [vmem:[#allocation7 + $0x50] sm:$0xff] }
  0x4f   :  { %914 = vmatpush3.bf16.msra.mxu1 %v1086_v23  ;;  %v1038_v15 = vpack.c.bf16 %v713_v14, %v712_v13  ;;  %v1041_v18 = vpack.c.bf16 %v715_v17, %v714_v16  ;;  %v717_v20 = vld [vmem:[#allocation7 + $0x58] sm:$0xff]  ;;  %v718_v22 = vld [vmem:[#allocation7 + $0x60] sm:$0xff]  ;;  %v719_v23 = vld [vmem:[#allocation7 + $0x68] sm:$0xff] }
  0x50   :  { %915 = vmatprep.subr.bf16.mxu1 %v1089_v26  ;;  %v1044_v21 = vpack.c.bf16 %v717_v20, %v716_v19  ;;  %v1047_v24 = vpack.c.bf16 %v719_v23, %v718_v22  ;;  %v721_v26 = vld [vmem:[#allocation7 + $0x78] sm:$0xff] }
  0x51   :  { %894 = vmatpush3.bf16.msra.mxu0 %v1088_v25  ;;  %v720_v25 = vld [vmem:[#allocation7 + $0x70] sm:$0xff] }
  0x52   :  { %895 = vmatprep.subr.bf16.mxu0 %v1091_v28 }
  0x53   :  { %916 = vmatpush3.bf16.msra.mxu1 %v1090_v27  ;;  %v1050_v27 = vpack.c.bf16 %v721_v26, %v720_v25 }
  0x54   :  { %917 = vmatprep.subr.bf16.mxu1 %v1093_v30 }
  0x55   :  { %896 = vmatpush3.bf16.msra.mxu0 %v1092_v29  ;;  %v816_v29 = vld [vmem:[%s1319_s2] ss:$0 sm:$0xff] }
  0x56   :  { %925 = vmatprep.subr.bf16.mxu0 %v1097_v35 }
  0x57   :  { %918 = vmatpush3.bf16.msra.mxu1 %v1096_v34 }
  0x58   :  { %578 = vmatmul.mubr.bf16.vlgmr.msra.gmra.mrb[0].mxu0 %v817_v32  ;;  %973 = vmatprep.subr.bf16.mxu1 %v1227_v42 }
  0x59   :  { %926 = vmatpush3.bf16.msra.mxu0 %v1100_v39  ;;  %657 = vmatprep.mubr.bf16.mxu0 %v822_v60 }
  0x5a   :  { %618 = vmatmul.mubr.bf16.vlgmr.msra.gmra.mrb[0].mxu1 %v819_v37  ;;  %927 = vmatprep.subr.bf16.mxu0 %v1102_v41 }
  0x5b   :  { %974 = vmatpush3.bf16.msra.mxu1 %v1101_v40  ;;  %989 = vmatprep.mubr.msk.bf16.mxu1 %vm1228_vm0, %v1227_v42 }
  0x5c   :  { %975 = vmatprep.subr.bf16.mxu1 %v1227_v42 }
  0x5d   :  { %928 = vmatpush3.bf16.msra.mxu0 %v1103_v43 }
  0x5e   :  { %929 = vmatprep.subr.bf16.mxu0 %v1105_v45 }
  0x5f   :  { %976 = vmatpush3.bf16.msra.mxu1 %v1104_v44 }
  0x60   :  { %977 = vmatprep.subr.bf16.mxu1 %v1227_v42 }
  0x61   :  { %930 = vmatpush3.bf16.msra.mxu0 %v1106_v46 }
  0x62   :  { %931 = vmatprep.subr.bf16.mxu0 %v1108_v48 }
  0x63   :  { %978 = vmatpush3.bf16.msra.mxu1 %v1107_v47 }
  0x64   :  { %979 = vmatprep.subr.bf16.mxu1 %v1227_v42 }
  0x65   :  { %932 = vmatpush3.bf16.msra.mxu0 %v1109_v49 }
  0x66   :  { %933 = vmatprep.subr.bf16.mxu0 %v1111_v50 }
  0x67   :  { %980 = vmatpush3.bf16.msra.mxu1 %v1110_v51 }
  0x68   :  { %981 = vmatprep.subr.bf16.mxu1 %v1227_v42 }
  0x69   :  { %934 = vmatpush3.bf16.msra.mxu0 %v1112_v52 }
  0x6a   :  { %935 = vmatprep.subr.bf16.mxu0 %v1114_v53  ;;  %v880_v53 = vld [vmem:[%s1321_s4] ss:$0 sm:$0xff] }
  0x6b   :  { %982 = vmatpush3.bf16.msra.mxu1 %v1113_v54 }
  0x6c   :  { %983 = vmatprep.subr.bf16.mxu1 %v1227_v42 }
  0x6d   :  { %936 = vmatpush3.bf16.msra.mxu0 %v1115_v55 }
  0x6e   :  { %937 = vmatprep.subr.bf16.mxu0 %v1117_v56 }
  0x6f   :  { %984 = vmatpush3.bf16.msra.mxu1 %v1116_v57 }
  0x70   :  { %985 = vmatprep.subr.bf16.mxu1 %v1227_v42 }
  0x71   :  { %938 = vmatpush3.bf16.msra.mxu0 %v1118_v59 }
  0x72   :  { %939 = vmatprep.subr.bf16.mxu0 %v1120_v61 }
  0x73   :  { %986 = vmatpush3.bf16.msra.mxu1 %v1119_v62 }
  0x74   :  { %987 = vmatprep.subr.bf16.mxu1 %v1227_v42 }
  0x75   :  { %940 = vmatpush3.bf16.msra.mxu0 %v1121_v63 }
  0x76   :  { %1028 = vmatprep.subr.bf16.mxu0 %v1229_v6 }
  0x77   :  { %988 = vmatpush3.bf16.msra.mxu1 %v1124_v0 }
  0x78   :  { %658 = vmatmul.mubr.bf16.vlgmr.msra.gmra.mrb[4].mxu0 %v821_v1 }
  0x79   :  { %1025 = vmatprep.mubr.msk.f32.mxu0 %vm1228_vm0, %v1227_v42  ;;  %1030 = vmatpush3.bf16.msra.mxu0 %v1029_v7 }
  0x7a   :  { %990 = vmatmul.mubr.bf16.vlgmr.msra.gmra.mrb[4].mxu1 %v1125_v2  ;;  %1031 = vmatprep.subr.bf16.mxu0 %v1229_v6 }
  0x7d   :  { %1033 = vmatpush3.bf16.msra.mxu0 %v1032_v9 }
  0x7e   :  { %1034 = vmatprep.subr.bf16.mxu0 %v1229_v6 }
  0x81   :  { %1036 = vmatpush3.bf16.msra.mxu0 %v1035_v12 }
  0x82   :  { %1037 = vmatprep.subr.bf16.mxu0 %v1229_v6 }
  0x85   :  { %1039 = vmatpush3.bf16.msra.mxu0 %v1038_v15 }
  0x86   :  { %1040 = vmatprep.subr.bf16.mxu0 %v1229_v6 }
  0x89   :  { %1042 = vmatpush3.bf16.msra.mxu0 %v1041_v18 }
  0x8a   :  { %1043 = vmatprep.subr.bf16.mxu0 %v1229_v6 }
  0x8d   :  { %1045 = vmatpush3.bf16.msra.mxu0 %v1044_v21 }
  0x8e   :  { %1046 = vmatprep.subr.bf16.mxu0 %v1229_v6 }
  0x91   :  { %1048 = vmatpush3.bf16.msra.mxu0 %v1047_v24 }
  0x92   :  { %1049 = vmatprep.subr.bf16.mxu0 %v1229_v6 }
  0x95   :  { %1051 = vmatpush3.bf16.msra.mxu0 %v1050_v27 }
 0x12b   :  { %v897_v28 = vpop.f32.mrb[0].mxu0 }
 0x12c   :  { %v898_v30 = vpop.f32.mrb[1].mxu0 }
 0x12d   :  { %v899_v31 = vadd.f32 %v898_v30, %v897_v28  ;;  %v900_v32 = vpop.f32.mrb[2].mxu0  ;;  %v919_v33 = vpop.f32.mrb[0].mxu1 }
 0x12e   :  { %v901_v34 = vpop.f32.mrb[3].mxu0  ;;  %v920_v35 = vpop.f32.mrb[1].mxu1 }
 0x12f   :  { %v580_v36 = vadd.f32 %v899_v31, %v816_v29  ;;  %v921_v37 = vadd.f32 %v920_v35, %v919_v33  ;;  %v922_v38 = vpop.f32.mrb[2].mxu1 }
 0x130   :  { %v923_v39 = vpop.f32.mrb[3].mxu1 }
 0x131   :  { %v620_v40 = vadd.f32 %v921_v37, %v580_v36 }
 0x14b   :  { %v941_v41 = vpop.f32.mrb[4].mxu0 }
 0x14c   :  { %v942_v42 = vpop.f32.mrb[5].mxu0 }
 0x14d   :  { %v943_v43 = vadd.f32 %v942_v42, %v941_v41  ;;  %v944_v44 = vpop.f32.mrb[6].mxu0  ;;  %v699_v45 = vpop.f32.mrb[4].mxu1 }
 0x14e   :  { %v945_v46 = vpop.f32.mrb[7].mxu0  ;;  %v991_v47 = vpop.f32.mrb[5].mxu1 }
 0x14f   :  { %v660_v48 = vadd.f32 %v943_v43, %v620_v40  ;;  %v702_v49 = vpop.f32.mrb[6].mxu1 }
 0x150   :  { %v992_v50 = vpop.f32.mrb[7].mxu1 }
 0x151   :  { %v700_v51 = vadd.f32 %v699_v45, %v660_v48 }
 0x153   :  { %v705_v52 = vmax.f32 %v700_v51, 0.0 }
 0x155   :  { %1026 = vmatmul.mubr.f32.vlgmr.msra.gmra.mrb[8].mxu0 %v705_v52 }
 0x228   :  { %v795_v54 = vpop.f32.mrb[8].mxu0 }
 0x229   :  { %v796_v55 = vadd.f32 %v880_v53, %v795_v54  ;;  %v1027_v56 = vpop.f32.mrb[9].mxu0 }
 0x22b   :  { %799 = vst [vmem:[#allocation8] sm:$0xff] %v796_v55 }
 0x22c   :  { %1203 = shalt.err (!%p1200_p0)
}
 0x22d   :  { %s1204_s13 = scalar_lea.hbm %s1322_s5, 128 }
 0x22e   :  { %p1205_p1 = scmp.ne.s32.totalorder %s1322_s5, %s1204_s13  ;;  %p1208_p2 = scmp.lt.u32.totalorder %s1204_s13, %s1322_s5 }
 0x230   :  { %p1210_p3 = pnand %p1208_p2, %p1205_p1 }
 0x232   :  { %1213 = shalt.err (!%p1210_p3)
}
 0x233   :  { %809 = dma.vmem_to_hbm [thread:$0]  %s807_s9, 128, %s1322_s5, [#allocation4]  }
 0x234   :  { %1218 = dma.done.wait [#allocation4], 128  }
 0x235   :  { %1219 = vsyncadd [#allocation4], 4294967168 }
 0x236   :  { %813 = vsyncpa [#allocation3], 1 }
 0x237   :  { %814 = vsyncpa [#allocation6], 1 }
 0x238   :  { %815 = vsyncpa [#allocation4], 1 }

</bundles_post_ra>
